<compile_context>
chip_gen: v6e
topology: v6e:2x2x1
jax: 0.10.0
libtpu: 0.0.40
codegen_flags: <defaults>
</compile_context>

<pallas_src>
import functools

import jax
import jax.numpy as jnp
from jax.experimental import pallas as pl
from jax.experimental.pallas import tpu as pltpu

_LANE = 128
_SUBLANE = 8


def _round_up(v, m):
    return (v + m - 1) // m * m


def _poly_kernel(x_ref, a_ref, s_ref, c_ref, o_ref, *, degree: int):
    # Grouped layout: W = 128*C.  Lane l of a row holds batch (row*128 + l//C),
    # center (l % C) -> every vreg fully packed.
    #   x_ref : (tile_r, W) VMEM      a_ref : (degree, W) VMEM (a tiled 128x)
    #   s_ref : (W, 128)   VMEM       c_ref : (1,) SMEM        o_ref : (tile_r, 128)
    x = x_ref[...].astype(jnp.float32)

    # Horner: p(x) = x*(a0 + x*(a1 + ... + x*a_{d-1}))   (static degree -> unrolled)
    acc = a_ref[degree - 1:degree, :].astype(jnp.float32)       # (1, W) row, bcast over rows
    for i in range(degree - 2, -1, -1):
        acc = acc * x + a_ref[i:i + 1, :].astype(jnp.float32)
    y = acc * x                                                  # (tile_r, W) per-element term

    # Per-batch sum over its C interleaved lanes via the (otherwise idle) MXU:
    # S[l, j] = 1 iff l // C == j.  Keeps the output lane-dense (tile_r, 128).
    o_ref[...] = jnp.dot(y, s_ref[...], preferred_element_type=jnp.float32) + c_ref[0]


def polynomial_forward(x, a, c, *, tile_r=None, vmem_budget_bytes=24 << 20):
    """x: (B, C), a: (degree, C), c: (1,)  ->  (B,) float32."""
    B, C = x.shape
    degree = a.shape[0]
    assert a.shape == (degree, C)
    W = _LANE * C

    # ---- Layout plumbing (free for 128-aligned batches; ragged pays one pad copy).
    B_pad = _round_up(B, _LANE)
    x_p = x if B_pad == B else jnp.pad(x, ((0, B_pad - B), (0, 0)))  # zero pad: padded
    R = B_pad // _LANE                                               # lanes can't contaminate
    x_g = x_p.reshape(R, W)                                          # free row-major reshape

    a_t = jnp.tile(a, (1, _LANE))                                    # (degree, W), matches lane order
    sel = (jnp.arange(W, dtype=jnp.int32)[:, None] // C
           == jnp.arange(_LANE, dtype=jnp.int32)[None, :]).astype(jnp.float32)  # (W, 128)

    # ---- Tile selection from the VMEM budget (real padded buffer sizes).
    x_row_bytes = W * x_g.dtype.itemsize
    out_row_bytes = _LANE * 4
    fixed = 2 * degree * W * a_t.dtype.itemsize + 2 * W * _LANE * 4 + (2 << 20)  # a, S, slack
    per_row = 2 * x_row_bytes + 2 * out_row_bytes                    # double-buffered in/out
    if tile_r is None:
        tile_r = max(_SUBLANE, (vmem_budget_bytes - fixed) // per_row)
        tile_r = min(tile_r, max(_SUBLANE, (8 << 20) // x_row_bytes))  # keep x tile <= ~8 MiB
        tile_r = max(_SUBLANE, tile_r // _SUBLANE * _SUBLANE)
        if R >= 16:  # guarantee >= 2 grid steps so both v7x TensorCores get work
            tile_r = min(tile_r, _round_up(pl.cdiv(R, 2), _SUBLANE))
    tile_r = int(tile_r)
    if tile_r >= R:
        tile_r = R                                                   # single full-extent block
    else:
        tile_r = max(_SUBLANE, tile_r // _SUBLANE * _SUBLANE)
    grid = (pl.cdiv(R, tile_r),)                                     # ragged tail clipped by Pallas

    need = fixed + tile_r * per_row
    vmem_limit = int(min(max(need + (8 << 20), 16 << 20), 48 << 20))  # v7x-safe, sized to need

    kernel = functools.partial(_poly_kernel, degree=degree)
    out = pl.pallas_call(
        kernel,
        out_shape=jax.ShapeDtypeStruct((R, _LANE), jnp.float32),
        grid=grid,
        in_specs=[
            pl.BlockSpec((tile_r, W), lambda i: (i, 0)),             # x tile (streamed)
            pl.BlockSpec((degree, W), lambda i: (0, 0)),             # a_t resident
            pl.BlockSpec((W, _LANE), lambda i: (0, 0)),              # selection matrix resident
            pl.BlockSpec(memory_space=pltpu.MemorySpace.SMEM),       # bias scalar in SMEM
        ],
        out_specs=pl.BlockSpec((tile_r, _LANE), lambda i: (i, 0)),   # lane-dense output
        compiler_params=pltpu.CompilerParams(
            dimension_semantics=("parallel",),
            vmem_limit_bytes=vmem_limit,
        ),
    )(x_g, a_t, sel, c.astype(jnp.float32))
    return out.reshape(-1)[:B]                                       # (B,) float32


def polynomial_reference(x, a, c):
    # Pure-JAX reference mirroring the PyTorch forward exactly (direct power series).
    degree = a.shape[0]
    y = sum(a[i, :] * x ** (i + 1) for i in range(degree))
    return jnp.sum(y, axis=1) + c


# TODO(synk): Polynomial.linear_reg is a NumPy pinv least-squares fitting helper
# (not part of the forward pass) and is intentionally not translated to Pallas.


if __name__ == "__main__":
    # Case 1: module-style small shapes (batch=8, centers=4, degree=2).
    batch, centers, degree = 8, 4, 2
    kx, ka, kc = jax.random.split(jax.random.PRNGKey(0), 3)
    x = jax.random.normal(kx, (batch, centers), dtype=jnp.float32)
    a = jax.random.normal(ka, (degree, centers), dtype=jnp.float32)
    c = jax.random.normal(kc, (1,), dtype=jnp.float32)
    out = jax.block_until_ready(polynomial_forward(x, a, c))
    ref = polynomial_reference(x, a, c)
    assert out.shape == (batch,)
    assert jnp.allclose(out, ref, atol=1e-5, rtol=1e-5), (out, ref)

    # Case 2: ragged batch, odd centers, degree > 2 (exercises pad + Horner).
    batch2, centers2, degree2 = 37, 3, 4
    k2x, k2a, k2c = jax.random.split(jax.random.PRNGKey(1), 3)
    x2 = jax.random.normal(k2x, (batch2, centers2), dtype=jnp.float32)
    a2 = jax.random.normal(k2a, (degree2, centers2), dtype=jnp.float32)
    c2 = jax.random.normal(k2c, (1,), dtype=jnp.float32)
    out2 = jax.block_until_ready(polynomial_forward(x2, a2, c2))
    ref2 = polynomial_reference(x2, a2, c2)
    assert out2.shape == (batch2,)
    assert jnp.allclose(out2, ref2, atol=1e-5, rtol=1e-4), (out2, ref2)

    # Case 3: multi-step grid with a partial final block (tile_r override).
    batch3, centers3, degree3 = 2100, 4, 3
    k3x, k3a, k3c = jax.random.split(jax.random.PRNGKey(2), 3)
    x3 = jax.random.normal(k3x, (batch3, centers3), dtype=jnp.float32)
    a3 = jax.random.normal(k3a, (degree3, centers3), dtype=jnp.float32)
    c3 = jax.random.normal(k3c, (1,), dtype=jnp.float32)
    out3 = jax.block_until_ready(polynomial_forward(x3, a3, c3, tile_r=8))
    ref3 = polynomial_reference(x3, a3, c3)
    assert out3.shape == (batch3,)
    assert jnp.allclose(out3, ref3, atol=1e-4, rtol=1e-4), (out3, ref3)

    # Case 4: bf16 inputs in HBM (halves the dominant stream); kernel upcasts to f32.
    batch4, centers4, degree4 = 512, 2, 2
    k4x, k4a, k4c = jax.random.split(jax.random.PRNGKey(3), 3)
    x4 = jax.random.normal(k4x, (batch4, centers4), dtype=jnp.bfloat16)
    a4 = jax.random.normal(k4a, (degree4, centers4), dtype=jnp.bfloat16)
    c4 = jax.random.normal(k4c, (1,), dtype=jnp.float32)
    out4 = jax.block_until_ready(polynomial_forward(x4, a4, c4))
    ref4 = polynomial_reference(x4.astype(jnp.float32), a4.astype(jnp.float32), c4)
    assert out4.shape == (batch4,)
    assert jnp.allclose(out4, ref4, atol=1e-4, rtol=1e-4), (out4, ref4)

    print("KERNEL_OK")
</pallas_src>

<mosaic_0001>
module attributes {stable_mosaic.version = 11 : i64} {
  func.func @_poly_kernel(%arg0: i32, %arg1: memref<1x512xf32, #tpu.memory_space<vmem>>, %arg2: memref<2x512xf32, #tpu.memory_space<vmem>>, %arg3: memref<512x128xf32, #tpu.memory_space<vmem>>, %arg4: memref<1xf32, #tpu.memory_space<smem>>, %arg5: memref<1x128xf32, #tpu.memory_space<vmem>>) attributes {dimension_semantics = [#tpu.dimension_semantics<parallel>], iteration_bounds = array<i64: 1>, scalar_prefetch = 0 : i64, scratch_operands = 0 : i64, tpu.core_type = #tpu.core_type<tc>, window_params = [{transform_indices = @transform_0, window_bounds = array<i64: 1, 512>}, {pipeline_mode = #tpu.pipeline_mode<synchronous>, transform_indices = @transform_1, window_bounds = array<i64: 2, 512>}, {pipeline_mode = #tpu.pipeline_mode<synchronous>, transform_indices = @transform_2, window_bounds = array<i64: 512, 128>}, {transform_indices = @transform_3, window_bounds = array<i64: 1>}, {transform_indices = @transform_4, window_bounds = array<i64: 1, 128>}]} {
    %c0 = arith.constant 0 : index
    %c0_0 = arith.constant 0 : index
    %0 = vector.load %arg1[%c0, %c0_0] : memref<1x512xf32, #tpu.memory_space<vmem>>, vector<1x512xf32>
    %c1 = arith.constant 1 : index
    %c0_1 = arith.constant 0 : index
    %1 = vector.load %arg2[%c1, %c0_1] : memref<2x512xf32, #tpu.memory_space<vmem>>, vector<1x512xf32>
    %2 = arith.mulf %1, %0 : vector<1x512xf32>
    %c0_2 = arith.constant 0 : index
    %c0_3 = arith.constant 0 : index
    %3 = vector.load %arg2[%c0_2, %c0_3] : memref<2x512xf32, #tpu.memory_space<vmem>>, vector<1x512xf32>
    %4 = arith.addf %2, %3 : vector<1x512xf32>
    %5 = arith.mulf %4, %0 : vector<1x512xf32>
    %c0_4 = arith.constant 0 : index
    %c0_5 = arith.constant 0 : index
    %6 = vector.load %arg3[%c0_4, %c0_5] : memref<512x128xf32, #tpu.memory_space<vmem>>, vector<512x128xf32>
    %cst = arith.constant dense<0.000000e+00> : vector<1x128xf32>
    %7 = tpu.matmul %5, %6, %cst {dimension_numbers = #tpu.dot_dimension_numbers<[1], [0], [0], [1], [0, 0, 1, 1], [], []>} : vector<1x512xf32>, vector<512x128xf32>, vector<1x128xf32> -> vector<1x128xf32>
    %c0_6 = arith.constant 0 : index
    %8 = memref.load %arg4[%c0_6] : memref<1xf32, #tpu.memory_space<smem>>
    %9 = vector.broadcast %8 : f32 to vector<1x128xf32>
    %10 = arith.addf %7, %9 : vector<1x128xf32>
    %c0_7 = arith.constant 0 : index
    %c0_8 = arith.constant 0 : index
    %11 = vector.load %arg5[%c0_7, %c0_8] : memref<1x128xf32, #tpu.memory_space<vmem>>, vector<1x128xf32>
    tpu.vector_store %arg5[%c0_7, %c0_8], %10 {strides = array<i32>} : memref<1x128xf32, #tpu.memory_space<vmem>>, vector<1x128xf32>,
    return
  }
  func.func @transform_0(%arg0: i32) -> (i32, i32) {
    %c0_i32 = arith.constant 0 : i32
    %c0_i32_0 = arith.constant 0 : i32
    return %arg0, %c0_i32 : i32, i32
  }
  func.func @transform_1(%arg0: i32) -> (i32, i32) {
    %c0_i32 = arith.constant 0 : i32
    %c0_i32_0 = arith.constant 0 : i32
    %c0_i32_1 = arith.constant 0 : i32
    return %c0_i32, %c0_i32_0 : i32, i32
  }
  func.func @transform_2(%arg0: i32) -> (i32, i32) {
    %c0_i32 = arith.constant 0 : i32
    %c0_i32_0 = arith.constant 0 : i32
    %c0_i32_1 = arith.constant 0 : i32
    return %c0_i32, %c0_i32_0 : i32, i32
  }
  func.func @transform_3(%arg0: i32) -> i32 {
    %c0_i32 = arith.constant 0 : i32
    %c0_i32_0 = arith.constant 0 : i32
    return %c0_i32 : i32
  }
  func.func @transform_4(%arg0: i32) -> (i32, i32) {
    %c0_i32 = arith.constant 0 : i32
    %c0_i32_0 = arith.constant 0 : i32
    return %arg0, %c0_i32 : i32, i32
  }
}

</mosaic_0001>

<bundles_post_ra>
// kernel: tpu_custom_call.1
= control target key start
LH: loop header
LB: loop body
LE: loop exit
PB: predicated region body
PF: predicated region fallthrough
CT: control target
= control target key end

     0   :  { %10 = vsyncpa [#allocation4], 0  ;;  %s515_s0 = inlined_call_operand.hbm [shape: f32[1,512], index: 0, kind: input, shape index: {}]   ;;  %s516_s1 = inlined_call_operand.hbm [shape: f32[2,512], index: 1, kind: input, shape index: {}]   ;;  %s517_s2 = inlined_call_operand.hbm [shape: f32[512,128], index: 2, kind: input, shape index: {}]   ;;  %s518_s3 = inlined_call_operand.<no memory space> [shape: f32[1], index: 3, kind: input, shape index: {}]   ;;  %s519_s4 = inlined_call_operand.hbm [shape: f32[1,128], index: 4, kind: output, shape index: {}]  }
   0x1   :  { %11 = vsyncpa [#allocation7], 0 }
   0x2   :  { %12 = vsyncpa [#allocation5], 0  ;;  %s469_s15 = smov [#allocation6]   ;;  %s470_s17 = smov [#allocation3]  }
   0x3   :  { %s29_s16 = sshll.u32 %s469_s15, 4  ;;  %s19_s18 = sshll.u32 %s470_s17, 4  ;;  %s30_s16 = int_to_ptr.vmem [resolvable:$true] %s29_s16  ;;  %s20_s18 = int_to_ptr.vmem [resolvable:$true] %s19_s18 }
   0x4   :  { %s391_s19 = scalar_lea.vmem %s30_s16, 128  ;;  %p396_p1 = scmp.lt.s32.totalorder %s30_s16, %s30_s16 }
   0x5   :  { %p392_p0 = scmp.ne.s32.totalorder %s30_s16, %s391_s19  ;;  %p397_p2 = scmp.lt.s32.totalorder %s391_s19, %s391_s19 }
   0x7   :  { %p398_p3 = por %p397_p2, %p396_p1 }
   0x9   :  { %p399_p4 = pnand %p398_p3, %p392_p0 }
   0xb   :  { %402 = shalt.err (!%p399_p4)
}
   0xc   :  { %32 = dma.hbm_to_vmem [thread:$0]  %s516_s1, 128, %s30_s16, [#allocation7]  }
   0xd   :  { %s411_s22 = scalar_lea.vmem %s20_s18, 64  ;;  %p416_p6 = scmp.lt.s32.totalorder %s20_s18, %s20_s18 }
   0xe   :  { %p412_p5 = scmp.ne.s32.totalorder %s20_s18, %s411_s22  ;;  %p417_p7 = scmp.lt.s32.totalorder %s411_s22, %s411_s22 }
  0x10   :  { %p418_p8 = por %p417_p7, %p416_p6 }
  0x12   :  { %p419_p9 = pnand %p418_p8, %p412_p5 }
  0x14   :  { %422 = shalt.err (!%p419_p9)
}
  0x15   :  { %22 = dma.hbm_to_vmem [thread:$0]  %s515_s0, 64, %s20_s18, [#allocation4]  }
  0x16   :  { %s471_s25 = smov [#allocation8]  }
  0x17   :  { %s38_s26 = sshll.u32 %s471_s25, 4  ;;  %s39_s26 = int_to_ptr.vmem [resolvable:$true] %s38_s26 }
  0x18   :  { %s431_s27 = scalar_lea.vmem %s39_s26, 8192  ;;  %p436_p11 = scmp.lt.s32.totalorder %s39_s26, %s39_s26 }
  0x19   :  { %p432_p10 = scmp.ne.s32.totalorder %s39_s26, %s431_s27  ;;  %p437_p12 = scmp.lt.s32.totalorder %s431_s27, %s431_s27 }
  0x1b   :  { %p438_p13 = por %p437_p12, %p436_p11 }
  0x1d   :  { %p439_p0 = pnand %p438_p13, %p432_p10 }
  0x1f   :  { %442 = shalt.err (!%p439_p0)
}
  0x20   :  { %s472_s1 = smov 128   ;;  %s473_s28 = smov 8  }
  0x21   :  { %44 = dma.hbm_to_vmem [thread:$0]  %s517_s2, 8192, %s39_s26, [#allocation7], %s472_s1, %s472_s1, %s473_s28  }
  0x22   :  { %463 = dma.done.wait [#allocation4], 64  }
  0x23   :  { %464 = vsyncadd [#allocation4], 4294967232 }
  0x24   :  { %465 = dma.done.wait [#allocation7], 8320  }
  0x25   :  { %466 = vsyncadd [#allocation7], 4294958976  ;;  %v94_v0 = vld [vmem:[#allocation8 + $0xf8] sm:$0xff]  ;;  %v93_v4 = vld [vmem:[#allocation8 + $0xf0] sm:$0xff]  ;;  %v130_v38 = vlaneseq  ;;  %s474_s5 = smov [#allocation9]  }
  0x26   :  { %v126_v1 = vld [vmem:[#allocation8 + $0x1f8] sm:$0xff]  ;;  %307 = vmatprep.subr.mxu0 %v94_v0  ;;  %v125_v5 = vld [vmem:[#allocation8 + $0x1f0] sm:$0xff]  ;;  %v92_v8 = vld [vmem:[#allocation8 + $0xe8] sm:$0xff]  ;;  %s297_s6 = sshll.u32 %s474_s5, 4  ;;  %s298_s6 = int_to_ptr.vmem [resolvable:$true] %s297_s6 }
  0x27   :  { %v78_v2 = vld [vmem:[#allocation8 + $0x78] sm:$0xff]  ;;  %342 = vmatprep.subr.mxu1 %v126_v1  ;;  %v77_v6 = vld [vmem:[#allocation8 + $0x70] sm:$0xff]  ;;  %v124_v9 = vld [vmem:[#allocation8 + $0x1e8] sm:$0xff]  ;;  %v131_v48 = vshrl.u32 %v130_v38, 7  ;;  %s443_s7 = scalar_lea.vmem %s298_s6, 16  ;;  %s447_s8 = scalar_lea.vmem %s298_s6, 32 }
  0x28   :  { %v110_v3 = vld [vmem:[#allocation8 + $0x178] sm:$0xff]  ;;  %308 = vmatpush3.msra.mxu0 %v78_v2  ;;  %v109_v7 = vld [vmem:[#allocation8 + $0x170] sm:$0xff]  ;;  %v76_v10 = vld [vmem:[#allocation8 + $0x68] sm:$0xff]  ;;  %p444_p1 = scmp.ne.s32.totalorder %s298_s6, %s443_s7  ;;  %p448_p2 = scmp.lt.s32.totalorder %s298_s6, %s298_s6 }
  0x29   :  { %343 = vmatpush3.msra.mxu1 %v110_v3  ;;  %309 = vmatprep.subr.mxu0 %v93_v4  ;;  %v108_v11 = vld [vmem:[#allocation8 + $0x168] sm:$0xff]  ;;  %v91_v12 = vld [vmem:[#allocation8 + $0xe0] sm:$0xff]  ;;  %v90_v16 = vld [vmem:[#allocation8 + $0xd8] sm:$0xff]  ;;  %v136_v61 = vsub.s32 1, %v131_v48  ;;  %v144_v0 = vsub.s32 3, %v131_v48  ;;  %v132_v4 = vsub.s32 0, %v131_v48  ;;  %p449_p3 = scmp.lt.s32.totalorder %s447_s8, %s443_s7 }
  0x2a   :  { %344 = vmatprep.subr.mxu1 %v125_v5  ;;  %310 = vmatpush3.msra.mxu0 %v77_v6  ;;  %v123_v13 = vld [vmem:[#allocation8 + $0x1e0] sm:$0xff]  ;;  %v122_v17 = vld [vmem:[#allocation8 + $0x1d8] sm:$0xff]  ;;  %v89_v20 = vld [vmem:[#allocation8 + $0xd0] sm:$0xff]  ;;  %v140_v5 = vsub.s32 2, %v131_v48 }
  0x2b   :  { %345 = vmatpush3.msra.mxu1 %v109_v7  ;;  %311 = vmatprep.subr.mxu0 %v92_v8  ;;  %v75_v14 = vld [vmem:[#allocation8 + $0x60] sm:$0xff]  ;;  %v74_v18 = vld [vmem:[#allocation8 + $0x58] sm:$0xff]  ;;  %v121_v21 = vld [vmem:[#allocation8 + $0x1d0] sm:$0xff]  ;;  %p450_p4 = por %p449_p3, %p448_p2 }
  0x2c   :  { %346 = vmatprep.subr.mxu1 %v124_v9  ;;  %v107_v15 = vld [vmem:[#allocation8 + $0x160] sm:$0xff]  ;;  %312 = vmatpush3.msra.mxu0 %v76_v10  ;;  %v106_v19 = vld [vmem:[#allocation8 + $0x158] sm:$0xff]  ;;  %v73_v22 = vld [vmem:[#allocation8 + $0x50] sm:$0xff] }
  0x2d   :  { %347 = vmatpush3.msra.mxu1 %v108_v11  ;;  %313 = vmatprep.subr.mxu0 %v91_v12  ;;  %v105_v23 = vld [vmem:[#allocation8 + $0x150] sm:$0xff]  ;;  %v88_v24 = vld [vmem:[#allocation8 + $0xc8] sm:$0xff]  ;;  %v87_v28 = vld [vmem:[#allocation8 + $0xc0] sm:$0xff]  ;;  %p451_p5 = pnand %p450_p4, %p444_p1 }
  0x2e   :  { %348 = vmatprep.subr.mxu1 %v123_v13  ;;  %314 = vmatpush3.msra.mxu0 %v75_v14  ;;  %v120_v25 = vld [vmem:[#allocation8 + $0x1c8] sm:$0xff]  ;;  %v119_v29 = vld [vmem:[#allocation8 + $0x1c0] sm:$0xff]  ;;  %v86_v32 = vld [vmem:[#allocation8 + $0xb8] sm:$0xff] }
  0x2f   :  { %349 = vmatpush3.msra.mxu1 %v107_v15  ;;  %315 = vmatprep.subr.mxu0 %v90_v16  ;;  %v72_v26 = vld [vmem:[#allocation8 + $0x48] sm:$0xff]  ;;  %v71_v30 = vld [vmem:[#allocation8 + $0x40] sm:$0xff]  ;;  %v118_v33 = vld [vmem:[#allocation8 + $0x1b8] sm:$0xff] }
  0x30   :  { %350 = vmatprep.subr.mxu1 %v122_v17  ;;  %316 = vmatpush3.msra.mxu0 %v74_v18  ;;  %v104_v27 = vld [vmem:[#allocation8 + $0x148] sm:$0xff]  ;;  %v103_v31 = vld [vmem:[#allocation8 + $0x140] sm:$0xff]  ;;  %v70_v34 = vld [vmem:[#allocation8 + $0x38] sm:$0xff]  ;;  %v128_v18 = vstv %s518_s3 }
  0x31   :  { %351 = vmatpush3.msra.mxu1 %v106_v19  ;;  %317 = vmatprep.subr.mxu0 %v89_v20  ;;  %v102_v35 = vld [vmem:[#allocation8 + $0x138] sm:$0xff]  ;;  %v85_v36 = vld [vmem:[#allocation8 + $0xb0] sm:$0xff]  ;;  %v84_v41 = vld [vmem:[#allocation8 + $0xa8] sm:$0xff] }
  0x32   :  { %352 = vmatprep.subr.mxu1 %v121_v21  ;;  %318 = vmatpush3.msra.mxu0 %v73_v22  ;;  %v117_v37 = vld [vmem:[#allocation8 + $0x1b0] sm:$0xff]  ;;  %v116_v42 = vld [vmem:[#allocation8 + $0x1a8] sm:$0xff]  ;;  %v83_v45 = vld [vmem:[#allocation8 + $0xa0] sm:$0xff] }
  0x33   :  { %353 = vmatpush3.msra.mxu1 %v105_v23  ;;  %319 = vmatprep.subr.mxu0 %v88_v24  ;;  %v69_v39 = vld [vmem:[#allocation8 + $0x30] sm:$0xff]  ;;  %v68_v43 = vld [vmem:[#allocation8 + $0x28] sm:$0xff]  ;;  %v115_v46 = vld [vmem:[#allocation8 + $0x1a0] sm:$0xff] }
  0x34   :  { %354 = vmatprep.subr.mxu1 %v120_v25  ;;  %320 = vmatpush3.msra.mxu0 %v72_v26  ;;  %v101_v40 = vld [vmem:[#allocation8 + $0x130] sm:$0xff]  ;;  %v100_v44 = vld [vmem:[#allocation8 + $0x128] sm:$0xff]  ;;  %v67_v47 = vld [vmem:[#allocation8 + $0x20] sm:$0xff] }
  0x35   :  { %355 = vmatpush3.msra.mxu1 %v104_v27  ;;  %321 = vmatprep.subr.mxu0 %v87_v28  ;;  %v99_v49 = vld [vmem:[#allocation8 + $0x120] sm:$0xff]  ;;  %v56_v50 = vld [vmem:[#allocation3] sm:$0xf]  ;;  %v58_v51 = vld [vmem:[#allocation6 + $0x1] ss:$2 sm:$0xf] }
  0x36   :  { %356 = vmatprep.subr.mxu1 %v119_v29  ;;  %322 = vmatpush3.msra.mxu0 %v71_v30  ;;  %v82_v52 = vld [vmem:[#allocation8 + $0x98] sm:$0xff]  ;;  %v59_v54 = vmul.f32 %v58_v51, %v56_v50  ;;  %v81_v58 = vld [vmem:[#allocation8 + $0x90] sm:$0xff]  ;;  %v80_v1 = vld [vmem:[#allocation8 + $0x88] sm:$0xff] }
  0x37   :  { %357 = vmatpush3.msra.mxu1 %v103_v31  ;;  %323 = vmatprep.subr.mxu0 %v86_v32  ;;  %v114_v53 = vld [vmem:[#allocation8 + $0x198] sm:$0xff]  ;;  %v113_v59 = vld [vmem:[#allocation8 + $0x190] sm:$0xff]  ;;  %v112_v2 = vld [vmem:[#allocation8 + $0x188] sm:$0xff] }
  0x38   :  { %358 = vmatprep.subr.mxu1 %v118_v33  ;;  %324 = vmatpush3.msra.mxu0 %v70_v34  ;;  %v60_v55 = vld [vmem:[#allocation6] ss:$2 sm:$0xf]  ;;  %v65_v62 = vld [vmem:[#allocation8 + $0x10] sm:$0xff]  ;;  %v64_v6 = vld [vmem:[#allocation8 + $0x8] sm:$0xff] }
  0x39   :  { %359 = vmatpush3.msra.mxu1 %v102_v35  ;;  %325 = vmatprep.subr.mxu0 %v85_v36  ;;  %v66_v56 = vld [vmem:[#allocation8 + $0x18] sm:$0xff]  ;;  %v61_v60 = vadd.f32 %v60_v55, %v59_v54  ;;  %v97_v63 = vld [vmem:[#allocation8 + $0x110] sm:$0xff]  ;;  %v96_v7 = vld [vmem:[#allocation8 + $0x108] sm:$0xff] }
  0x3a   :  { %360 = vmatprep.subr.mxu1 %v117_v37  ;;  %326 = vmatpush3.msra.mxu0 %v69_v39  ;;  %v98_v57 = vld [vmem:[#allocation8 + $0x118] sm:$0xff]  ;;  %v79_v8 = vld [vmem:[#allocation8 + $0x80] sm:$0xff] }
  0x3b   :  { %361 = vmatpush3.msra.mxu1 %v101_v40  ;;  %327 = vmatprep.subr.mxu0 %v84_v41  ;;  %v62_v3 = vmul.f32 %v61_v60, %v56_v50  ;;  %v111_v9 = vld [vmem:[#allocation8 + $0x180] sm:$0xff] }
  0x3c   :  { %362 = vmatprep.subr.mxu1 %v116_v42  ;;  %328 = vmatpush3.msra.mxu0 %v68_v43  ;;  %v63_v11 = vld [vmem:[#allocation8] sm:$0xff] }
  0x3d   :  { %363 = vmatpush3.msra.mxu1 %v100_v44  ;;  %329 = vmatprep.subr.mxu0 %v83_v45  ;;  %v137_v10 = vrot.slane %v62_v3, %v136_v61  ;;  %v145_v12 = vrot.slane %v62_v3, %v144_v0  ;;  %v95_v13 = vld [vmem:[#allocation8 + $0x100] sm:$0xff]  ;;  %v133_v14 = vrot.slane %v62_v3, %v132_v4 }
  0x3e   :  { %364 = vmatprep.subr.mxu1 %v115_v46  ;;  %330 = vmatpush3.msra.mxu0 %v67_v47  ;;  %v141_v15 = vrot.slane %v62_v3, %v140_v5 }
  0x3f   :  { %365 = vmatpush3.msra.mxu1 %v99_v49  ;;  %331 = vmatprep.subr.mxu0 %v82_v52 }
  0x40   :  { %366 = vmatprep.subr.mxu1 %v114_v53  ;;  %332 = vmatpush3.msra.mxu0 %v66_v56 }
  0x41   :  { %367 = vmatpush3.msra.mxu1 %v98_v57  ;;  %333 = vmatprep.subr.mxu0 %v81_v58 }
  0x42   :  { %368 = vmatprep.subr.mxu1 %v113_v59  ;;  %334 = vmatpush3.msra.mxu0 %v65_v62 }
  0x43   :  { %369 = vmatpush3.msra.mxu1 %v97_v63  ;;  %335 = vmatprep.subr.mxu0 %v80_v1 }
  0x44   :  { %370 = vmatprep.subr.mxu1 %v112_v2  ;;  %336 = vmatpush3.msra.mxu0 %v64_v6 }
  0x45   :  { %371 = vmatpush3.msra.mxu1 %v96_v7  ;;  %337 = vmatprep.subr.mxu0 %v79_v8 }
  0x46   :  { %372 = vmatprep.subr.mxu1 %v111_v9  ;;  %338 = vmatpush3.msra.mxu0 %v63_v11 }
  0x47   :  { %214 = vmatprep.mubr.f32.mxu0 %v137_v10  ;;  %373 = vmatpush3.msra.mxu1 %v95_v13 }
  0x48   :  { %284 = vmatprep.mubr.f32.mxu1 %v145_v12  ;;  %215 = vmatmul.mubr.f32.vlgmr.msra.gmra.mxu0 %v133_v14 }
  0x49   :  { %285 = vmatmul.mubr.f32.vlgmr.msra.gmra.mxu1 %v141_v15 }
 0x108   :  { %v339_v16 = vpop.f32.mrf.mxu0 }
 0x109   :  { %v374_v17 = vpop.f32.mrf.mxu1 }
 0x10a   :  { %v340_v19 = vpop.f32.mrf.mxu0 }
 0x10b   :  { %v375_v20 = vpop.f32.mrf.mxu1  ;;  %v341_v21 = vadd.f32 %v340_v19, %v339_v16 }
 0x10c   :  { %v376_v23 = vadd.f32 %v375_v20, %v374_v17 }
 0x10d   :  { %v217_v22 = vadd.f32 %v341_v21, %v128_v18 }
 0x10f   :  { %v287_v24 = vadd.f32 %v376_v23, %v217_v22 }
 0x111   :  { %290 = vst [vmem:[#allocation9] sm:$0x1] %v287_v24 }
 0x112   :  { %454 = shalt.err (!%p451_p5)
}
 0x113   :  { %300 = dma.vmem_to_hbm [thread:$0]  %s298_s6, 16, %s519_s4, [#allocation5]  }
 0x114   :  { %467 = dma.done.wait [#allocation5], 16  }
 0x115   :  { %468 = vsyncadd [#allocation5], 4294967280 }
 0x116   :  { %304 = vsyncpa [#allocation4], 1 }
 0x117   :  { %305 = vsyncpa [#allocation7], 1 }
 0x118   :  { %306 = vsyncpa [#allocation5], 1 }

</bundles_post_ra>
